<compile_context>
chip_gen: v6e
topology: v6e:2x2x1
jax: 0.10.0
libtpu: 0.0.40
codegen_flags: <defaults>
</compile_context>

<pallas_src>
import functools
import math

import jax
import jax.numpy as jnp
from jax.experimental import pallas as pl
from jax.experimental.pallas import tpu as pltpu


def _sdpa_kernel(*refs, scale, has_mask, with_attn):
    if has_mask:
        q_ref, k_ref, v_ref, m_ref = refs[:4]
        out_refs = refs[4:]
    else:
        q_ref, k_ref, v_ref = refs[:3]
        m_ref = None
        out_refs = refs[3:]
    o_ref = out_refs[0]
    attn_ref = out_refs[1] if with_attn else None

    gb, g, tq, dk = q_ref.shape
    lk = k_ref.shape[2]
    dv = v_ref.shape[3]
    n = gb * g

    # Fold 1/temperature into q in the input dtype (matches torch `q / temperature`).
    # Leading-dim reshapes (gb, g) -> (gb*g) are layout no-ops (last two dims untouched).
    q = q_ref[...].reshape(n, tq, dk) * scale
    k = k_ref[...].reshape(n, lk, dk)
    v = v_ref[...].reshape(n, lk, dv)

    # QK^T: contract the last dims directly (no XLU transpose), MXU fed in the input
    # dtype with an f32 accumulator.
    s = jnp.einsum("gqd,gkd->gqk", q, k, preferred_element_type=jnp.float32)
    s = s.reshape(gb, g, tq, lk)

    if has_mask:
        # attn.masked_fill(mask == 0, -1e9); mask block broadcasts over batch/head axes.
        s = jnp.where(m_ref[...] == 0, jnp.float32(-1000000000.0), s)

    # numerically stable softmax over keys
    s = s - jnp.max(s, axis=-1, keepdims=True)
    e = jnp.exp(s)
    d = jnp.sum(e, axis=-1, keepdims=True)
    inv = pl.reciprocal(d, approx=True)   # EUP vrcp slot (nearly free)
    inv = inv * (2.0 - d * inv)           # one Newton step -> f32-accurate, 1e-5 parity

    if with_attn:
        p = e * inv
        o = jnp.einsum("gqk,gkd->gqd",
                       p.reshape(n, tq, lk).astype(v.dtype), v,
                       preferred_element_type=jnp.float32)
        o_ref[...] = o.reshape(gb, g, tq, dv).astype(o_ref.dtype)
        attn_ref[...] = p.astype(attn_ref.dtype)
    else:
        # Normalize after PV: TQ*Dv multiplies instead of TQ*Lk, and no attn HBM write.
        o = jnp.einsum("gqk,gkd->gqd",
                       e.reshape(n, tq, lk).astype(v.dtype), v,
                       preferred_element_type=jnp.float32)
        o_ref[...] = (o.reshape(gb, g, tq, dv) * inv).astype(o_ref.dtype)


def _physical_vmem_bytes():
    try:
        return int(pltpu.get_tpu_info().vmem_capacity_bytes)
    except Exception:
        return 64 << 20  # conservative fallback = v7x per-TC VMEM


def _select_tiling(B, H, Lq, Lk, Dk, Dv, isz, has_mask, with_attn, budget):
    """Pick (GB batches, G heads, TQ q-rows) per grid step within the VMEM budget."""

    def est(gb, g, tq):
        # double-buffered input/output blocks
        blk = gb * g * (tq * Dk + Lk * (Dk + Dv) + tq * Dv) * isz
        if with_attn:
            blk += gb * g * tq * Lk * isz
        if has_mask:
            blk += gb * g * tq * Lk                      # int8 mask, upper bound
        # ~3.5x f32 TQxLk live temporaries (s, e, p + dtype-cast copy)
        tmp = gb * g * (7 * tq * Lk * 4) // 2
        return 2 * blk + tmp

    # q tile: full extent when it fits, else the largest (8,128)-legal divisor that fits,
    # else the smallest candidate (shrink TQ instead of inflating the VMEM limit).
    tq = Lq
    if est(1, 1, Lq) > budget:
        cands = [t for t in (1024, 512, 256, 128) if Lq % t == 0]
        if cands:
            tq = cands[-1]
            for t in cands:  # descending: first fit = largest
                if est(1, 1, t) <= budget:
                    tq = t
                    break

    # heads per step
    g = 1
    for cand in range(2, H + 1):
        if H % cand == 0 and est(1, cand, tq) <= budget:
            g = cand
    # batches per step (amortizes per-step overhead at small shapes)
    gb = 1
    for cand in range(2, B + 1):
        if B % cand == 0 and est(cand, g, tq) <= budget:
            gb = cand
    return gb, g, tq, est(gb, g, tq)


def scaled_dot_product_attention(q, k, v, temperature, mask=None, return_attn=True):
    """Pallas TPU ScaledDotProductAttention.forward.

    q: [B, H, Lq, Dk], k: [B, H, Lk, Dk], v: [B, H, Lk, Dv]
    mask (optional): broadcastable to [B, H, Lq, Lk]; positions where mask == 0 get
    -1e9 before softmax (matches masked_fill).
    Returns (output, attn) when return_attn=True (torch semantics), otherwise just
    output (skips the attn HBM write, the dominant traffic at long Lk).
    """
    B, H, Lq, Dk = q.shape
    Lk = k.shape[2]
    Dv = v.shape[3]
    isz = jnp.dtype(q.dtype).itemsize
    scale = 1.0 / float(temperature)
    has_mask = mask is not None

    # Generation-aware VMEM policy.
    phys = _physical_vmem_bytes()                         # 128 MiB v5e/v6e, 64 MiB v7x
    vmem_cap = max(min(phys - (12 << 20), 100 << 20), 16 << 20)
    budget = max(16 << 20, min(56 << 20, vmem_cap - (8 << 20)))

    GB, G, TQ, est = _select_tiling(B, H, Lq, Lk, Dk, Dv, isz, has_mask,
                                    return_attn, budget)
    # Always set the scoped limit (v5e default is only 16 MiB), never above physical.
    vmem_limit = int(min(max(est + (8 << 20), 24 << 20), vmem_cap))

    grid = (B // GB, H // G, Lq // TQ)
    q_spec = pl.BlockSpec((GB, G, TQ, Dk), lambda b, h, t: (b, h, t, 0))
    k_spec = pl.BlockSpec((GB, G, Lk, Dk), lambda b, h, t: (b, h, 0, 0))
    v_spec = pl.BlockSpec((GB, G, Lk, Dv), lambda b, h, t: (b, h, 0, 0))
    o_spec = pl.BlockSpec((GB, G, TQ, Dv), lambda b, h, t: (b, h, t, 0))
    a_spec = pl.BlockSpec((GB, G, TQ, Lk), lambda b, h, t: (b, h, t, 0))

    in_specs = [q_spec, k_spec, v_spec]
    inputs = [q, k, v]
    if has_mask:
        m4 = jnp.asarray(mask)
        while m4.ndim < 4:
            m4 = m4[None]
        # keep batch/head axes un-broadcast in HBM when they are 1; compare BEFORE the
        # int8 cast so non-binary float masks behave like torch's `mask == 0`.
        mB = B if m4.shape[0] == B else 1
        mH = H if m4.shape[1] == H else 1
        mb = (jnp.broadcast_to(m4, (mB, mH, Lq, Lk)) != 0).astype(jnp.int8)
        mb_blk = GB if mB == B else 1
        mh_blk = G if mH == H else 1

        def m_index(b, h, t, _mB=mB, _mH=mH):
            return (b if _mB == B else 0, h if _mH == H else 0, t, 0)

        in_specs.append(pl.BlockSpec((mb_blk, mh_blk, TQ, Lk), m_index))
        inputs.append(mb)

    if return_attn:
        out_shape = (jax.ShapeDtypeStruct((B, H, Lq, Dv), q.dtype),
                     jax.ShapeDtypeStruct((B, H, Lq, Lk), q.dtype))
        out_specs = (o_spec, a_spec)
    else:
        out_shape = jax.ShapeDtypeStruct((B, H, Lq, Dv), q.dtype)
        out_specs = o_spec

    # TODO(synk): on v7x, mark the batch axis pltpu.CORE_PARALLEL (or drive via core_map)
    # to shard the grid across both TensorCores; kept plain "parallel" here for safety.
    params = pltpu.CompilerParams(
        dimension_semantics=("parallel", "parallel", "parallel"),
        vmem_limit_bytes=vmem_limit,
    )

    kern = functools.partial(_sdpa_kernel, scale=scale, has_mask=has_mask,
                             with_attn=return_attn)
    return pl.pallas_call(
        kern,
        out_shape=out_shape,
        grid=grid,
        in_specs=in_specs,
        out_specs=out_specs,
        compiler_params=params,
    )(*inputs)


def _reference(q, k, v, temperature, mask=None):
    attn = jnp.einsum("bhqd,bhkd->bhqk", q / temperature, k)
    if mask is not None:
        attn = jnp.where(mask == 0, -1000000000.0, attn)
    attn = jax.nn.softmax(attn, axis=-1)
    out = jnp.einsum("bhqk,bhkd->bhqd", attn, v)
    return out, attn


if __name__ == "__main__":
    B, H, Lq, Lk, Dk, Dv = 2, 4, 8, 8, 32, 32
    temperature = math.sqrt(Dk)

    key = jax.random.PRNGKey(0)
    kq, kk, kv, km = jax.random.split(key, 4)
    q = jax.random.normal(kq, (B, H, Lq, Dk), dtype=jnp.float32)
    k = jax.random.normal(kk, (B, H, Lk, Dk), dtype=jnp.float32)
    v = jax.random.normal(kv, (B, H, Lk, Dv), dtype=jnp.float32)
    mask = (jax.random.uniform(km, (B, 1, Lq, Lk)) > 0.2).astype(jnp.int32)

    # no-mask path
    out, attn = scaled_dot_product_attention(q, k, v, temperature)
    jax.block_until_ready((out, attn))
    out_r, attn_r = _reference(q, k, v, temperature)
    assert jnp.allclose(out, out_r, atol=1e-5, rtol=1e-5)
    assert jnp.allclose(attn, attn_r, atol=1e-5, rtol=1e-5)

    # masked path (broadcast head dim)
    out_m, attn_m = scaled_dot_product_attention(q, k, v, temperature, mask=mask)
    jax.block_until_ready((out_m, attn_m))
    out_mr, attn_mr = _reference(q, k, v, temperature, mask)
    assert jnp.allclose(out_m, out_mr, atol=1e-5, rtol=1e-5)
    assert jnp.allclose(attn_m, attn_mr, atol=1e-5, rtol=1e-5)

    # masked path with a per-head mask (exercises the mH == H BlockSpec)
    mask_h = jnp.broadcast_to(mask, (B, H, Lq, Lk))
    out_h, attn_h = scaled_dot_product_attention(q, k, v, temperature, mask=mask_h)
    jax.block_until_ready((out_h, attn_h))
    assert jnp.allclose(out_h, out_mr, atol=1e-5, rtol=1e-5)
    assert jnp.allclose(attn_h, attn_mr, atol=1e-5, rtol=1e-5)

    # output-only fast path (attn HBM write skipped)
    out_f = scaled_dot_product_attention(q, k, v, temperature, mask=mask,
                                         return_attn=False)
    jax.block_until_ready(out_f)
    assert jnp.allclose(out_f, out_mr, atol=1e-5, rtol=1e-5)

    print("KERNEL_OK")
</pallas_src>

<mosaic_0001>
module attributes {stable_mosaic.version = 11 : i64} {
  func.func @_sdpa_kernel(%arg0: i32, %arg1: i32, %arg2: i32, %arg3: memref<2x4x8x32xf32, #tpu.memory_space<vmem>>, %arg4: memref<2x4x8x32xf32, #tpu.memory_space<vmem>>, %arg5: memref<2x4x8x32xf32, #tpu.memory_space<vmem>>, %arg6: memref<2x4x8x32xf32, #tpu.memory_space<vmem>>, %arg7: memref<2x4x8x8xf32, #tpu.memory_space<vmem>>) attributes {dimension_semantics = [#tpu.dimension_semantics<parallel>, #tpu.dimension_semantics<parallel>, #tpu.dimension_semantics<parallel>], iteration_bounds = array<i64: 1, 1, 1>, scalar_prefetch = 0 : i64, scratch_operands = 0 : i64, tpu.core_type = #tpu.core_type<tc>, window_params = [{transform_indices = @transform_0, window_bounds = array<i64: 2, 4, 8, 32>}, {transform_indices = @transform_1, window_bounds = array<i64: 2, 4, 8, 32>}, {transform_indices = @transform_2, window_bounds = array<i64: 2, 4, 8, 32>}, {transform_indices = @transform_3, window_bounds = array<i64: 2, 4, 8, 32>}, {transform_indices = @transform_4, window_bounds = array<i64: 2, 4, 8, 8>}]} {
    %c0 = arith.constant 0 : index
    %c0_0 = arith.constant 0 : index
    %c0_1 = arith.constant 0 : index
    %c0_2 = arith.constant 0 : index
    %0 = vector.load %arg3[%c0, %c0_0, %c0_1, %c0_2] : memref<2x4x8x32xf32, #tpu.memory_space<vmem>>, vector<2x4x8x32xf32>
    %1 = vector.shape_cast %0 : vector<2x4x8x32xf32> to vector<8x8x32xf32>
    %cst = arith.constant 0.176776692 : f32
    %2 = vector.broadcast %cst : f32 to vector<8x8x32xf32>
    %3 = arith.mulf %1, %2 : vector<8x8x32xf32>
    %c0_3 = arith.constant 0 : index
    %c0_4 = arith.constant 0 : index
    %c0_5 = arith.constant 0 : index
    %c0_6 = arith.constant 0 : index
    %4 = vector.load %arg4[%c0_3, %c0_4, %c0_5, %c0_6] : memref<2x4x8x32xf32, #tpu.memory_space<vmem>>, vector<2x4x8x32xf32>
    %5 = vector.shape_cast %4 : vector<2x4x8x32xf32> to vector<8x8x32xf32>
    %c0_7 = arith.constant 0 : index
    %c0_8 = arith.constant 0 : index
    %c0_9 = arith.constant 0 : index
    %c0_10 = arith.constant 0 : index
    %6 = vector.load %arg5[%c0_7, %c0_8, %c0_9, %c0_10] : memref<2x4x8x32xf32, #tpu.memory_space<vmem>>, vector<2x4x8x32xf32>
    %7 = vector.shape_cast %6 : vector<2x4x8x32xf32> to vector<8x8x32xf32>
    "tpu.trace_start"() <{level = 10 : i32, message = "gqd,gkd->gqk"}> : () -> ()
    %cst_11 = arith.constant dense<0.000000e+00> : vector<8x8x8xf32>
    %8 = tpu.matmul %3, %5, %cst_11 {dimension_numbers = #tpu.dot_dimension_numbers<[2], [2], [1], [1], [0, 0, 0, 1, 1, 1], [0], [0]>} : vector<8x8x32xf32>, vector<8x8x32xf32>, vector<8x8x8xf32> -> vector<8x8x8xf32>
    "tpu.trace_stop"() : () -> ()
    %9 = vector.shape_cast %8 : vector<8x8x8xf32> to vector<2x4x8x8xf32>
    %cst_12 = arith.constant dense<0xFF800000> : vector<2x4x8xf32>
    %10 = vector.multi_reduction <maximumf>, %9, %cst_12 [3] : vector<2x4x8x8xf32> to vector<2x4x8xf32>
    %11 = vector.shape_cast %10 : vector<2x4x8xf32> to vector<2x4x8x1xf32>
    %12 = vector.broadcast %11 : vector<2x4x8x1xf32> to vector<2x4x8x8xf32>
    %13 = arith.subf %9, %12 : vector<2x4x8x8xf32>
    %14 = math.exp %13 : vector<2x4x8x8xf32>
    %cst_13 = arith.constant dense<0.000000e+00> : vector<2x4x8xf32>
    %15 = vector.multi_reduction <add>, %14, %cst_13 [3] : vector<2x4x8x8xf32> to vector<2x4x8xf32>
    %16 = vector.shape_cast %15 : vector<2x4x8xf32> to vector<2x4x8x1xf32>
    %17 = tpu.reciprocal %16 {approx = true} : vector<2x4x8x1xf32> -> vector<2x4x8x1xf32>
    %18 = arith.mulf %16, %17 : vector<2x4x8x1xf32>
    %cst_14 = arith.constant 2.000000e+00 : f32
    %19 = vector.broadcast %cst_14 : f32 to vector<2x4x8x1xf32>
    %20 = arith.subf %19, %18 : vector<2x4x8x1xf32>
    %21 = arith.mulf %17, %20 : vector<2x4x8x1xf32>
    %22 = vector.broadcast %21 : vector<2x4x8x1xf32> to vector<2x4x8x8xf32>
    %23 = arith.mulf %14, %22 : vector<2x4x8x8xf32>
    %24 = vector.shape_cast %23 : vector<2x4x8x8xf32> to vector<8x8x8xf32>
    "tpu.trace_start"() <{level = 10 : i32, message = "gqk,gkd->gqd"}> : () -> ()
    %cst_15 = arith.constant dense<0.000000e+00> : vector<8x8x32xf32>
    %25 = tpu.matmul %24, %7, %cst_15 {dimension_numbers = #tpu.dot_dimension_numbers<[2], [1], [1], [2], [0, 0, 0, 1, 1, 2], [0], [0]>} : vector<8x8x8xf32>, vector<8x8x32xf32>, vector<8x8x32xf32> -> vector<8x8x32xf32>
    "tpu.trace_stop"() : () -> ()
    %26 = vector.shape_cast %25 : vector<8x8x32xf32> to vector<2x4x8x32xf32>
    %c0_16 = arith.constant 0 : index
    %c0_17 = arith.constant 0 : index
    %c0_18 = arith.constant 0 : index
    %c0_19 = arith.constant 0 : index
    %27 = vector.load %arg6[%c0_16, %c0_17, %c0_18, %c0_19] : memref<2x4x8x32xf32, #tpu.memory_space<vmem>>, vector<2x4x8x32xf32>
    tpu.vector_store %arg6[%c0_16, %c0_17, %c0_18, %c0_19], %26 {strides = array<i32>} : memref<2x4x8x32xf32, #tpu.memory_space<vmem>>, vector<2x4x8x32xf32>,
    %c0_20 = arith.constant 0 : index
    %c0_21 = arith.constant 0 : index
    %c0_22 = arith.constant 0 : index
    %c0_23 = arith.constant 0 : index
    %28 = vector.load %arg7[%c0_20, %c0_21, %c0_22, %c0_23] : memref<2x4x8x8xf32, #tpu.memory_space<vmem>>, vector<2x4x8x8xf32>
    tpu.vector_store %arg7[%c0_20, %c0_21, %c0_22, %c0_23], %23 {strides = array<i32>} : memref<2x4x8x8xf32, #tpu.memory_space<vmem>>, vector<2x4x8x8xf32>,
    return
  }
  func.func @transform_0(%arg0: i32, %arg1: i32, %arg2: i32) -> (i32, i32, i32, i32) {
    %c0_i32 = arith.constant 0 : i32
    %c0_i32_0 = arith.constant 0 : i32
    return %arg0, %arg1, %arg2, %c0_i32 : i32, i32, i32, i32
  }
  func.func @transform_1(%arg0: i32, %arg1: i32, %arg2: i32) -> (i32, i32, i32, i32) {
    %c0_i32 = arith.constant 0 : i32
    %c0_i32_0 = arith.constant 0 : i32
    %c0_i32_1 = arith.constant 0 : i32
    return %arg0, %arg1, %c0_i32, %c0_i32_0 : i32, i32, i32, i32
  }
  func.func @transform_2(%arg0: i32, %arg1: i32, %arg2: i32) -> (i32, i32, i32, i32) {
    %c0_i32 = arith.constant 0 : i32
    %c0_i32_0 = arith.constant 0 : i32
    %c0_i32_1 = arith.constant 0 : i32
    return %arg0, %arg1, %c0_i32, %c0_i32_0 : i32, i32, i32, i32
  }
  func.func @transform_3(%arg0: i32, %arg1: i32, %arg2: i32) -> (i32, i32, i32, i32) {
    %c0_i32 = arith.constant 0 : i32
    %c0_i32_0 = arith.constant 0 : i32
    return %arg0, %arg1, %arg2, %c0_i32 : i32, i32, i32, i32
  }
  func.func @transform_4(%arg0: i32, %arg1: i32, %arg2: i32) -> (i32, i32, i32, i32) {
    %c0_i32 = arith.constant 0 : i32
    %c0_i32_0 = arith.constant 0 : i32
    return %arg0, %arg1, %arg2, %c0_i32 : i32, i32, i32, i32
  }
}

</mosaic_0001>

<bundles_post_ra>
// kernel: tpu_custom_call.1
= control target key start
LH: loop header
LB: loop body
LE: loop exit
PB: predicated region body
PF: predicated region fallthrough
CT: control target
= control target key end

     0   :  { %10 = vsyncpa [#allocation3], 0  ;;  %s1928_s0 = inlined_call_operand.hbm [shape: f32[2,4,8,32], index: 0, kind: input, shape index: {}]   ;;  %s1929_s1 = inlined_call_operand.hbm [shape: f32[2,4,8,32], index: 1, kind: input, shape index: {}]   ;;  %s1930_s2 = inlined_call_operand.hbm [shape: f32[2,4,8,32], index: 2, kind: input, shape index: {}]   ;;  %s1931_s3 = inlined_call_operand.hbm [shape: f32[2,4,8,32], index: 3, kind: output, shape index: {0}]   ;;  %s1932_s4 = inlined_call_operand.hbm [shape: f32[2,4,8,8], index: 4, kind: output, shape index: {1}]  }
   0x1   :  { %11 = vsyncpa [#allocation6], 0 }
   0x2   :  { %12 = vsyncpa [#allocation4], 0 }
   0x3   :  { %13 = vsyncpa [#allocation10], 0  ;;  %s1732_s15 = smov [#allocation5]   ;;  %s1733_s17 = smov [#allocation2]  }
   0x4   :  { %s31_s16 = sshll.u32 %s1732_s15, 4  ;;  %s19_s18 = sshll.u32 %s1733_s17, 4  ;;  %s32_s16 = int_to_ptr.vmem [resolvable:$true] %s31_s16  ;;  %s20_s18 = int_to_ptr.vmem [resolvable:$true] %s19_s18 }
   0x5   :  { %s1632_s19 = scalar_lea.vmem %s32_s16, 1024  ;;  %p1637_p1 = scmp.lt.s32.totalorder %s32_s16, %s32_s16 }
   0x6   :  { %p1633_p0 = scmp.ne.s32.totalorder %s32_s16, %s1632_s19  ;;  %p1638_p2 = scmp.lt.s32.totalorder %s1632_s19, %s1632_s19 }
   0x8   :  { %p1639_p3 = por %p1638_p2, %p1637_p1 }
   0xa   :  { %p1640_p4 = pnand %p1639_p3, %p1633_p0 }
   0xc   :  { %1643 = shalt.err (!%p1640_p4)
}
   0xd   :  { %s1734_s20 = smov 128   ;;  %s1735_s21 = smov 8  }
   0xe   :  { %37 = dma.hbm_to_vmem [thread:$0]  %s1929_s1, 1024, %s32_s16, [#allocation6], %s1734_s20, %s1734_s20, %s1735_s21  }
   0xf   :  { %s1652_s24 = scalar_lea.vmem %s20_s18, 1024  ;;  %p1657_p6 = scmp.lt.s32.totalorder %s20_s18, %s20_s18 }
  0x10   :  { %p1653_p5 = scmp.ne.s32.totalorder %s20_s18, %s1652_s24  ;;  %p1658_p7 = scmp.lt.s32.totalorder %s1652_s24, %s1652_s24 }
  0x12   :  { %p1659_p8 = por %p1658_p7, %p1657_p6 }
  0x14   :  { %p1660_p9 = pnand %p1659_p8, %p1653_p5 }
  0x16   :  { %1663 = shalt.err (!%p1660_p9)
}
  0x17   :  { %25 = dma.hbm_to_vmem [thread:$0]  %s1928_s0, 1024, %s20_s18, [#allocation3], %s1734_s20, %s1734_s20, %s1735_s21  }
  0x18   :  { %s1736_s27 = smov [#allocation7]  }
  0x19   :  { %s43_s28 = sshll.u32 %s1736_s27, 4  ;;  %s44_s28 = int_to_ptr.vmem [resolvable:$true] %s43_s28 }
  0x1a   :  { %s1672_s29 = scalar_lea.vmem %s44_s28, 1024  ;;  %p1677_p11 = scmp.lt.s32.totalorder %s44_s28, %s44_s28 }
  0x1b   :  { %p1673_p10 = scmp.ne.s32.totalorder %s44_s28, %s1672_s29  ;;  %p1678_p12 = scmp.lt.s32.totalorder %s1672_s29, %s1672_s29 }
  0x1d   :  { %p1679_p13 = por %p1678_p12, %p1677_p11 }
  0x1f   :  { %p1680_p0 = pnand %p1679_p13, %p1673_p10 }
  0x21   :  { %1683 = shalt.err (!%p1680_p0)
}
  0x22   :  { %49 = dma.hbm_to_vmem [thread:$0]  %s1930_s2, 1024, %s44_s28, [#allocation6], %s1734_s20, %s1734_s20, %s1735_s21  }
  0x23   :  { %1724 = dma.done.wait [#allocation3], 1024  }
  0x24   :  { %1725 = vsyncadd [#allocation3], 4294966272 }
  0x25   :  { %1726 = dma.done.wait [#allocation6], 2048  }
  0x26   :  { %1727 = vsyncadd [#allocation6], 4294965248  ;;  %v1737_v0 = vmov 0.0   ;;  %vm1738_vm0 = vmmov 0   ;;  %vm91_vm1 = vcmask 261120   ;;  %v75_v1 = vld [vmem:[#allocation5] sm:$0xff] }
  0x27   :  { %1503 = vmatprep.subr.mxu0 %v1737_v0  ;;  %1505 = vmatprep.mubr.msk.f32.mxu0 %vm1738_vm0, %v1737_v0  ;;  %v59_v2 = vld [vmem:[#allocation2] sm:$0xff]  ;;  %v76_v3 = vld [vmem:[#allocation5 + $0x8] sm:$0xff]  ;;  %v61_v6 = vld [vmem:[#allocation2 + $0x10] sm:$0xff]  ;;  %vm700_vm2 = vcmask 64512   ;;  %s1739_s0 = smov [#allocation9]  }
  0x28   :  { %1508 = vmatprep.subr.mxu1 %v1737_v0  ;;  %1510 = vmatprep.mubr.msk.f32.mxu1 %vm1738_vm0, %v1737_v0  ;;  %v67_v4 = vmul.f32 0.17677669, %v59_v2  ;;  %v60_v5 = vld [vmem:[#allocation2 + $0x8] sm:$0xff]  ;;  %v77_v7 = vld [vmem:[#allocation5 + $0x10] sm:$0xff]  ;;  %v78_v9 = vld [vmem:[#allocation5 + $0x18] sm:$0xff]  ;;  %s1430_s2 = sshll.u32 %s1739_s0, 4  ;;  %s1431_s2 = int_to_ptr.vmem [resolvable:$true] %s1430_s2 }
  0x29   :  { %1504 = vmatpush3.xpose.msk.msra.mxu0 %vm91_vm1, %v75_v1  ;;  %1509 = vmatpush3.xpose.msk.msra.mxu1 %vm91_vm1, %v76_v3  ;;  %v68_v8 = vmul.f32 0.17677669, %v60_v5  ;;  %v62_v10 = vld [vmem:[#allocation2 + $0x18] sm:$0xff]  ;;  %v69_v11 = vmul.f32 0.17677669, %v61_v6  ;;  %v63_v13 = vld [vmem:[#allocation2 + $0x20] sm:$0xff]  ;;  %p1689_p2 = scmp.lt.s32.totalorder %s1431_s2, %s1431_s2 }
  0x2a   :  { %1513 = vmatprep.subr.mxu0 %v1737_v0  ;;  %1518 = vmatprep.subr.mxu1 %v1737_v0  ;;  %v70_v12 = vmul.f32 0.17677669, %v62_v10  ;;  %v79_v14 = vld [vmem:[#allocation5 + $0x20] sm:$0xff]  ;;  %v64_v15 = vld [vmem:[#allocation2 + $0x28] sm:$0xff]  ;;  %v71_v17 = vmul.f32 0.17677669, %v63_v13 }
  0x2b   :  { %v80_v16 = vld [vmem:[#allocation5 + $0x28] sm:$0xff]  ;;  %v72_v18 = vmul.f32 0.17677669, %v64_v15  ;;  %v65_v19 = vld [vmem:[#allocation2 + $0x30] sm:$0xff]  ;;  %v66_v21 = vld [vmem:[#allocation2 + $0x38] sm:$0xff]  ;;  %s1684_s5 = scalar_lea.vmem %s1431_s2, 1024 }
  0x2c   :  { %1506 = vmatmul.mubr.msk.f32.vlgmr.msra.gmra.mxu0 %vm91_vm1, %v67_v4  ;;  %1511 = vmatmul.mubr.msk.f32.vlgmr.msra.gmra.mxu1 %vm91_vm1, %v68_v8  ;;  %v81_v20 = vld [vmem:[#allocation5 + $0x30] sm:$0xff]  ;;  %v82_v22 = vld [vmem:[#allocation5 + $0x38] sm:$0xff]  ;;  %v73_v23 = vmul.f32 0.17677669, %v65_v19  ;;  %v74_v24 = vmul.f32 0.17677669, %v66_v21  ;;  %p1685_p1 = scmp.ne.s32.totalorder %s1431_s2, %s1684_s5  ;;  %p1690_p3 = scmp.lt.s32.totalorder %s1684_s5, %s1684_s5 }
  0x2d   :  { %1514 = vmatpush3.xpose.msk.msra.mxu0 %vm91_vm1, %v77_v7  ;;  %1515 = vmatprep.mubr.msk.f32.mxu0 %vm1738_vm0, %v1737_v0 }
  0x2e   :  { %1519 = vmatpush3.xpose.msk.msra.mxu1 %vm91_vm1, %v78_v9  ;;  %1523 = vmatprep.subr.mxu0 %v1737_v0  ;;  %p1691_p4 = por %p1690_p3, %p1689_p2 }
  0x2f   :  { %1520 = vmatprep.mubr.msk.f32.mxu1 %vm1738_vm0, %v1737_v0  ;;  %1528 = vmatprep.subr.mxu1 %v1737_v0 }
  0x30   :  { %1516 = vmatmul.mubr.msk.f32.vlgmr.msra.gmra.mxu0 %vm91_vm1, %v69_v11  ;;  %p1692_p5 = pnand %p1691_p4, %p1685_p1 }
  0x31   :  { %1524 = vmatpush3.xpose.msk.msra.mxu0 %vm91_vm1, %v79_v14  ;;  %1521 = vmatmul.mubr.msk.f32.vlgmr.msra.gmra.mxu1 %vm91_vm1, %v70_v12 }
  0x32   :  { %1525 = vmatprep.mubr.msk.f32.mxu0 %vm1738_vm0, %v1737_v0  ;;  %1529 = vmatpush3.xpose.msk.msra.mxu1 %vm91_vm1, %v80_v16 }
  0x33   :  { %1533 = vmatprep.subr.mxu0 %v1737_v0  ;;  %1530 = vmatprep.mubr.msk.f32.mxu1 %vm1738_vm0, %v1737_v0 }
  0x34   :  { %1526 = vmatmul.mubr.msk.f32.vlgmr.msra.gmra.mxu0 %vm91_vm1, %v71_v17  ;;  %1538 = vmatprep.subr.mxu1 %v1737_v0 }
  0x35   :  { %1534 = vmatpush3.xpose.msk.msra.mxu0 %vm91_vm1, %v81_v20  ;;  %1531 = vmatmul.mubr.msk.f32.vlgmr.msra.gmra.mxu1 %vm91_vm1, %v72_v18 }
  0x36   :  { %1535 = vmatprep.mubr.msk.f32.mxu0 %vm1738_vm0, %v1737_v0  ;;  %1539 = vmatpush3.xpose.msk.msra.mxu1 %vm91_vm1, %v82_v22 }
  0x37   :  { %1540 = vmatprep.mubr.msk.f32.mxu1 %vm1738_vm0, %v1737_v0  ;;  %1543 = vmatprep.subr.mxu0 %v1737_v0 }
  0x38   :  { %1536 = vmatmul.mubr.msk.f32.vlgmr.msra.gmra.mxu0 %vm91_vm1, %v73_v23  ;;  %1548 = vmatprep.subr.mxu1 %v1737_v0 }
  0x39   :  { %1541 = vmatmul.mubr.msk.f32.vlgmr.msra.gmra.mxu1 %vm91_vm1, %v74_v24  ;;  %1545 = vmatprep.mubr.msk.f32.mxu0 %vm1738_vm0, %v1737_v0 }
  0x3a   :  { %1550 = vmatprep.mubr.msk.f32.mxu1 %vm1738_vm0, %v1737_v0 }
  0xec   :  { %v164_v25 = vpop.f32.mrf.mxu0  ;;  %v240_v26 = vpop.f32.mrf.mxu1 }
  0xed   :  { %v701_v27 = vsel %vm700_vm2, %v164_v25, -inf  ;;  %v704_v30 = vsel %vm700_vm2, %v240_v26, -inf }
  0xee   :  { %702 = vmax.xlane.f32.xlu0 %v701_v27  ;;  %v1507_v28 = vpop.f32.mrf.mxu0  ;;  %v1512_v29 = vpop.f32.mrf.mxu1  ;;  %v84_v27 = vld [vmem:[#allocation7 + $0x8] sm:$0xff] }
  0xef   :  { %1549 = vmatpush3.msra.mxu1 %v84_v27 }
  0xf0   :  { %v316_v31 = vpop.f32.mrf.mxu0  ;;  %1558 = vmatprep.subr.mxu1 %v1737_v0 }
  0xf1   :  { %v707_v32 = vsel %vm700_vm2, %v316_v31, -inf  ;;  %v392_v33 = vpop.f32.mrf.mxu1 }
  0xf2   :  { %705 = vmax.xlane.f32.xlu0 %v704_v30  ;;  %708 = vmax.xlane.f32.xlu1 %v707_v32  ;;  %v1517_v34 = vpop.f32.mrf.mxu0  ;;  %v710_v36 = vsel %vm700_vm2, %v392_v33, -inf }
  0xf3   :  { %v1522_v35 = vpop.f32.mrf.mxu1 }
  0xf4   :  { %v468_v37 = vpop.f32.mrf.mxu0 }
  0xf5   :  { %v713_v38 = vsel %vm700_vm2, %v468_v37, -inf  ;;  %v544_v39 = vpop.f32.mrf.mxu1 }
  0xf6   :  { %711 = vmax.xlane.f32.xlu1 %v710_v36  ;;  %714 = vmax.xlane.f32.xlu0 %v713_v38  ;;  %v1527_v40 = vpop.f32.mrf.mxu0  ;;  %v716_v42 = vsel %vm700_vm2, %v544_v39, -inf }
  0xf7   :  { %v1532_v41 = vpop.f32.mrf.mxu1 }
  0xf8   :  { %v620_v43 = vpop.f32.mrf.mxu0 }
  0xf9   :  { %v719_v44 = vsel %vm700_vm2, %v620_v43, -inf  ;;  %v696_v45 = vpop.f32.mrf.mxu1 }
  0xfa   :  { %717 = vmax.xlane.f32.xlu1 %v716_v42  ;;  %720 = vmax.xlane.f32.xlu0 %v719_v44  ;;  %v1537_v46 = vpop.f32.mrf.mxu0  ;;  %v722_v48 = vsel %vm700_vm2, %v696_v45, -inf }
  0xfb   :  { %v1542_v47 = vpop.f32.mrf.mxu1  ;;  %v85_v46 = vld [vmem:[#allocation7 + $0x10] sm:$0xff] }
  0xfe   :  { %723 = vmax.xlane.f32.xlu1 %v722_v48 }
 0x177   :  { %v703_v49 = vpop.xlane.xlu0 %702 }
 0x178   :  { %v725_v50 = vsub.f32 %v164_v25, %v703_v49 }
 0x17a   :  { %v733_v51 = vmul.f32 1.442695, %v725_v50 }
 0x17b   :  { %v706_v52 = vpop.xlane.xlu0 %705  ;;  %v709_v53 = vpop.xlane.xlu1 %708 }
 0x17c   :  { %1592 = vpow2.f32 %v733_v51  ;;  %v726_v54 = vsub.f32 %v240_v26, %v706_v52  ;;  %v727_v55 = vsub.f32 %v316_v31, %v709_v53  ;;  %v83_v26 = vld [vmem:[#allocation7] sm:$0xff] }
 0x17d   :  { %1544 = vmatpush3.msra.mxu0 %v83_v26 }
 0x17e   :  { %v735_v56 = vmul.f32 1.442695, %v726_v54  ;;  %v737_v57 = vmul.f32 1.442695, %v727_v55  ;;  %1553 = vmatprep.subr.mxu0 %v1737_v0 }
 0x17f   :  { %v712_v58 = vpop.xlane.xlu1 %711  ;;  %v715_v59 = vpop.xlane.xlu0 %714 }
 0x180   :  { %1594 = vpow2.f32 %v735_v56  ;;  %v728_v60 = vsub.f32 %v392_v33, %v712_v58  ;;  %v729_v61 = vsub.f32 %v468_v37, %v715_v59  ;;  %v86_v56 = vld [vmem:[#allocation7 + $0x18] sm:$0xff] }
 0x181   :  { %1596 = vpow2.f32 %v737_v57 }
 0x182   :  { %v739_v62 = vmul.f32 1.442695, %v728_v60  ;;  %v741_v63 = vmul.f32 1.442695, %v729_v61  ;;  %v87_v60 = vld [vmem:[#allocation7 + $0x20] sm:$0xff] }
 0x183   :  { %v718_v1 = vpop.xlane.xlu1 %717  ;;  %v721_v2 = vpop.xlane.xlu0 %720 }
 0x184   :  { %1598 = vpow2.f32 %v739_v62  ;;  %v730_v3 = vsub.f32 %v544_v39, %v718_v1  ;;  %v731_v4 = vsub.f32 %v620_v43, %v721_v2 }
 0x185   :  { %1600 = vpow2.f32 %v741_v63 }
 0x186   :  { %v743_v5 = vmul.f32 1.442695, %v730_v3  ;;  %v745_v6 = vmul.f32 1.442695, %v731_v4 }
 0x187   :  { %v724_v7 = vpop.xlane.xlu1 %723 }
 0x188   :  { %1602 = vpow2.f32 %v743_v5  ;;  %v732_v8 = vsub.f32 %v696_v45, %v724_v7  ;;  %v88_v5 = vld [vmem:[#allocation7 + $0x28] sm:$0xff] }
 0x189   :  { %v1593_v9 = vpop.eup %1592  ;;  %1604 = vpow2.f32 %v745_v6 }
 0x18a   :  { %v747_v10 = vmul.f32 1.442695, %v732_v8  ;;  %v749_v11 = vsel %vm700_vm2, %v1593_v9, 0.0 }
 0x18b   :  { %750 = vadd.xlane.f32.xlu0 %v749_v11 }
 0x18c   :  { %1606 = vpow2.f32 %v747_v10 }
 0x18d   :  { %v1839_v12 = vpop.eup %1594 }
 0x18e   :  { %v1841_v13 = vpop.eup %1596  ;;  %v752_v14 = vsel %vm700_vm2, %v1839_v12, 0.0 }
 0x18f   :  { %753 = vadd.xlane.f32.xlu1 %v752_v14  ;;  %v755_v15 = vsel %vm700_vm2, %v1841_v13, 0.0 }
 0x190   :  { %756 = vadd.xlane.f32.xlu0 %v755_v15  ;;  %v90_v15 = vld [vmem:[#allocation7 + $0x38] sm:$0xff] }
 0x191   :  { %v1847_v16 = vpop.eup %1598 }
 0x192   :  { %v1849_v17 = vpop.eup %1600  ;;  %v758_v18 = vsel %vm700_vm2, %v1847_v16, 0.0 }
 0x193   :  { %759 = vadd.xlane.f32.xlu1 %v758_v18  ;;  %v761_v19 = vsel %vm700_vm2, %v1849_v17, 0.0 }
 0x194   :  { %762 = vadd.xlane.f32.xlu0 %v761_v19 }
 0x195   :  { %v1855_v20 = vpop.eup %1602 }
 0x196   :  { %v1857_v21 = vpop.eup %1604  ;;  %v764_v22 = vsel %vm700_vm2, %v1855_v20, 0.0 }
 0x197   :  { %765 = vadd.xlane.f32.xlu1 %v764_v22  ;;  %v767_v23 = vsel %vm700_vm2, %v1857_v21, 0.0 }
 0x198   :  { %768 = vadd.xlane.f32.xlu0 %v767_v23 }
 0x199   :  { %v1863_v24 = vpop.eup %1606 }
 0x19a   :  { %v770_v25 = vsel %vm700_vm2, %v1863_v24, 0.0 }
 0x19b   :  { %771 = vadd.xlane.f32.xlu1 %v770_v25 }
 0x214   :  { %v751_v28 = vpop.xlane.xlu0 %750 }
 0x215   :  { %1608 = vrcp.f32 %v751_v28 }
 0x218   :  { %v754_v29 = vpop.xlane.xlu1 %753 }
 0x219   :  { %1610 = vrcp.f32 %v754_v29  ;;  %v757_v30 = vpop.xlane.xlu0 %756 }
 0x21a   :  { %1612 = vrcp.f32 %v757_v30 }
 0x21c   :  { %v760_v31 = vpop.xlane.xlu1 %759 }
 0x21d   :  { %1614 = vrcp.f32 %v760_v31  ;;  %v763_v32 = vpop.xlane.xlu0 %762 }
 0x21e   :  { %1616 = vrcp.f32 %v763_v32 }
 0x220   :  { %v766_v33 = vpop.xlane.xlu1 %765 }
 0x221   :  { %1618 = vrcp.f32 %v766_v33  ;;  %v769_v34 = vpop.xlane.xlu0 %768 }
 0x222   :  { %v1609_v35 = vpop.eup %1608  ;;  %1620 = vrcp.f32 %v769_v34 }
 0x223   :  { %v781_v36 = vmul.f32 %v1609_v35, %v751_v28 }
 0x224   :  { %v772_v37 = vpop.xlane.xlu1 %771 }
 0x225   :  { %v789_v38 = vsub.f32 2.0, %v781_v36  ;;  %1622 = vrcp.f32 %v772_v37 }
 0x226   :  { %v1611_v39 = vpop.eup %1610 }
 0x227   :  { %v1613_v40 = vpop.eup %1612  ;;  %v797_v41 = vmul.f32 %v1609_v35, %v789_v38  ;;  %v782_v42 = vmul.f32 %v1611_v39, %v754_v29 }
 0x228   :  { %v783_v43 = vmul.f32 %v1613_v40, %v757_v30 }
 0x229   :  { %v805_v44 = vmul.f32 %v1593_v9, %v797_v41  ;;  %v790_v45 = vsub.f32 2.0, %v782_v42  ;;  %v89_v9 = vld [vmem:[#allocation7 + $0x30] sm:$0xff] }
 0x22a   :  { %v1615_v47 = vpop.eup %1614  ;;  %v791_v48 = vsub.f32 2.0, %v783_v43 }
 0x22b   :  { %v1617_v49 = vpop.eup %1616  ;;  %1405 = vst.msk [vmem:[#allocation9] sm:$0xff] %vm700_vm2, %v805_v44  ;;  %v798_v50 = vmul.f32 %v1611_v39, %v790_v45  ;;  %v784_v51 = vmul.f32 %v1615_v47, %v760_v31  ;;  %1546 = vmatmul.mubr.msk.f32.vlgmr.msra.gmra.mxu0 %vm700_vm2, %v805_v44 }
 0x22c   :  { %v799_v52 = vmul.f32 %v1613_v40, %v791_v48  ;;  %v785_v53 = vmul.f32 %v1617_v49, %v763_v32  ;;  %1554 = vmatpush3.msra.mxu0 %v85_v46  ;;  %1555 = vmatprep.mubr.msk.f32.mxu0 %vm1738_vm0, %v1737_v0 }
 0x22d   :  { %v806_v54 = vmul.f32 %v1839_v12, %v798_v50  ;;  %v792_v55 = vsub.f32 2.0, %v784_v51  ;;  %1563 = vmatprep.subr.mxu0 %v1737_v0 }
 0x22e   :  { %v1619_v57 = vpop.eup %1618  ;;  %v807_v58 = vmul.f32 %v1841_v13, %v799_v52  ;;  %v793_v59 = vsub.f32 2.0, %v785_v53 }
 0x22f   :  { %v1621_v61 = vpop.eup %1620  ;;  %1406 = vst.msk [vmem:[#allocation9 + $0x8] sm:$0xff] %vm700_vm2, %v806_v54  ;;  %v800_v62 = vmul.f32 %v1615_v47, %v792_v55  ;;  %v786_v63 = vmul.f32 %v1619_v57, %v766_v33  ;;  %1551 = vmatmul.mubr.msk.f32.vlgmr.msra.gmra.mxu1 %vm700_vm2, %v806_v54 }
 0x230   :  { %1407 = vst.msk [vmem:[#allocation9 + $0x10] sm:$0xff] %vm700_vm2, %v807_v58  ;;  %v801_v1 = vmul.f32 %v1617_v49, %v793_v59  ;;  %v787_v2 = vmul.f32 %v1621_v61, %v769_v34  ;;  %1556 = vmatmul.mubr.msk.f32.vlgmr.msra.gmra.mxu0 %vm700_vm2, %v807_v58  ;;  %1559 = vmatpush3.msra.mxu1 %v86_v56 }
 0x231   :  { %v808_v3 = vmul.f32 %v1847_v16, %v800_v62  ;;  %v794_v4 = vsub.f32 2.0, %v786_v63  ;;  %1560 = vmatprep.mubr.msk.f32.mxu1 %vm1738_vm0, %v1737_v0  ;;  %1564 = vmatpush3.msra.mxu0 %v87_v60 }
 0x232   :  { %v1623_v6 = vpop.eup %1622  ;;  %v809_v7 = vmul.f32 %v1849_v17, %v801_v1  ;;  %v795_v8 = vsub.f32 2.0, %v787_v2  ;;  %1565 = vmatprep.mubr.msk.f32.mxu0 %vm1738_vm0, %v1737_v0  ;;  %1568 = vmatprep.subr.mxu1 %v1737_v0 }
 0x233   :  { %1408 = vst.msk [vmem:[#allocation9 + $0x18] sm:$0xff] %vm700_vm2, %v808_v3  ;;  %v802_v10 = vmul.f32 %v1619_v57, %v794_v4  ;;  %v788_v11 = vmul.f32 %v1623_v6, %v772_v37  ;;  %1561 = vmatmul.mubr.msk.f32.vlgmr.msra.gmra.mxu1 %vm700_vm2, %v808_v3  ;;  %1573 = vmatprep.subr.mxu0 %v1737_v0 }
 0x234   :  { %1409 = vst.msk [vmem:[#allocation9 + $0x20] sm:$0xff] %vm700_vm2, %v809_v7  ;;  %v803_v12 = vmul.f32 %v1621_v61, %v795_v8  ;;  %1566 = vmatmul.mubr.msk.f32.vlgmr.msra.gmra.mxu0 %vm700_vm2, %v809_v7  ;;  %1569 = vmatpush3.msra.mxu1 %v88_v5 }
 0x235   :  { %v810_v13 = vmul.f32 %v1855_v20, %v802_v10  ;;  %v796_v14 = vsub.f32 2.0, %v788_v11  ;;  %1570 = vmatprep.mubr.msk.f32.mxu1 %vm1738_vm0, %v1737_v0  ;;  %1574 = vmatpush3.msra.mxu0 %v89_v9 }
 0x236   :  { %v811_v16 = vmul.f32 %v1857_v21, %v803_v12  ;;  %1575 = vmatprep.mubr.msk.f32.mxu0 %vm1738_vm0, %v1737_v0  ;;  %1578 = vmatprep.subr.mxu1 %v1737_v0 }
 0x237   :  { %1410 = vst.msk [vmem:[#allocation9 + $0x28] sm:$0xff] %vm700_vm2, %v810_v13  ;;  %v804_v17 = vmul.f32 %v1623_v6, %v796_v14  ;;  %1571 = vmatmul.mubr.msk.f32.vlgmr.msra.gmra.mxu1 %vm700_vm2, %v810_v13 }
 0x238   :  { %1411 = vst.msk [vmem:[#allocation9 + $0x30] sm:$0xff] %vm700_vm2, %v811_v16  ;;  %1576 = vmatmul.mubr.msk.f32.vlgmr.msra.gmra.mxu0 %vm700_vm2, %v811_v16  ;;  %1579 = vmatpush3.msra.mxu1 %v90_v15 }
 0x239   :  { %v812_v18 = vmul.f32 %v1863_v24, %v804_v17  ;;  %1580 = vmatprep.mubr.msk.f32.mxu1 %vm1738_vm0, %v1737_v0 }
 0x23b   :  { %1412 = vst.msk [vmem:[#allocation9 + $0x38] sm:$0xff] %vm700_vm2, %v812_v18  ;;  %1581 = vmatmul.mubr.msk.f32.vlgmr.msra.gmra.mxu1 %vm700_vm2, %v812_v18 }
 0x23c   :  { %1695 = shalt.err (!%p1692_p5)
}
 0x23d   :  { %1436 = dma.vmem_to_hbm [thread:$0]  %s1431_s2, 1024, %s1932_s4, [#allocation10], %s1734_s20, %s1734_s20, %s1735_s21  }
 0x23e   :  { %s1740_s4 = smov [#allocation8]  }
 0x23f   :  { %s1418_s8 = sshll.u32 %s1740_s4, 4  ;;  %s1419_s8 = int_to_ptr.vmem [resolvable:$true] %s1418_s8 }
 0x240   :  { %s1704_s9 = scalar_lea.vmem %s1419_s8, 1024  ;;  %p1709_p7 = scmp.lt.s32.totalorder %s1419_s8, %s1419_s8 }
 0x241   :  { %p1705_p6 = scmp.ne.s32.totalorder %s1419_s8, %s1704_s9  ;;  %p1710_p8 = scmp.lt.s32.totalorder %s1704_s9, %s1704_s9 }
 0x243   :  { %p1711_p9 = por %p1710_p8, %p1709_p7 }
 0x245   :  { %p1712_p10 = pnand %p1711_p9, %p1705_p6 }
 0x2eb   :  { %v882_v0 = vpop.f32.mrf.mxu0 }
 0x2ec   :  { %1397 = vst.msk [vmem:[#allocation8] sm:$0xff] %vm91_vm1, %v882_v0 }
 0x2ed   :  { %v1547_v19 = vpop.f32.mrf.mxu0 }
 0x2ef   :  { %v955_v20 = vpop.f32.mrf.mxu1 }
 0x2f0   :  { %1398 = vst.msk [vmem:[#allocation8 + $0x8] sm:$0xff] %vm91_vm1, %v955_v20  ;;  %v1028_v21 = vpop.f32.mrf.mxu0 }
 0x2f1   :  { %1399 = vst.msk [vmem:[#allocation8 + $0x10] sm:$0xff] %vm91_vm1, %v1028_v21  ;;  %v1552_v22 = vpop.f32.mrf.mxu1 }
 0x2f2   :  { %v1557_v23 = vpop.f32.mrf.mxu0 }
 0x2f3   :  { %v1101_v24 = vpop.f32.mrf.mxu1 }
 0x2f4   :  { %1400 = vst.msk [vmem:[#allocation8 + $0x18] sm:$0xff] %vm91_vm1, %v1101_v24  ;;  %v1174_v25 = vpop.f32.mrf.mxu0 }
 0x2f5   :  { %1401 = vst.msk [vmem:[#allocation8 + $0x20] sm:$0xff] %vm91_vm1, %v1174_v25  ;;  %v1562_v26 = vpop.f32.mrf.mxu1 }
 0x2f6   :  { %v1567_v27 = vpop.f32.mrf.mxu0 }
 0x2f7   :  { %v1247_v28 = vpop.f32.mrf.mxu1 }
 0x2f8   :  { %1402 = vst.msk [vmem:[#allocation8 + $0x28] sm:$0xff] %vm91_vm1, %v1247_v28  ;;  %v1320_v29 = vpop.f32.mrf.mxu0 }
 0x2f9   :  { %1403 = vst.msk [vmem:[#allocation8 + $0x30] sm:$0xff] %vm91_vm1, %v1320_v29  ;;  %v1572_v30 = vpop.f32.mrf.mxu1 }
 0x2fa   :  { %v1577_v31 = vpop.f32.mrf.mxu0 }
 0x2fb   :  { %v1393_v32 = vpop.f32.mrf.mxu1 }
 0x2fc   :  { %1404 = vst.msk [vmem:[#allocation8 + $0x38] sm:$0xff] %vm91_vm1, %v1393_v32 }
 0x2fd   :  { %v1582_v33 = vpop.f32.mrf.mxu1 }
 0x2fe   :  { %1715 = shalt.err (!%p1712_p10)
}
 0x2ff   :  { %1424 = dma.vmem_to_hbm [thread:$0]  %s1419_s8, 1024, %s1931_s3, [#allocation4], %s1734_s20, %s1734_s20, %s1735_s21  }
 0x300   :  { %1728 = dma.done.wait [#allocation4], 1024  }
 0x301   :  { %1729 = vsyncadd [#allocation4], 4294966272 }
 0x302   :  { %1730 = dma.done.wait [#allocation10], 1024  }
 0x303   :  { %1731 = vsyncadd [#allocation10], 4294966272 }
 0x304   :  { %1443 = vsyncpa [#allocation3], 1 }
 0x305   :  { %1444 = vsyncpa [#allocation6], 1 }
 0x306   :  { %1445 = vsyncpa [#allocation4], 1 }
 0x307   :  { %1446 = vsyncpa [#allocation10], 1 }

</bundles_post_ra>
